<compile_context>
chip_gen: v6e
topology: v6e:2x2x1
jax: 0.10.0
libtpu: 0.0.40
codegen_flags: <defaults>
</compile_context>

<pallas_src>
import jax
import jax.numpy as jnp
from jax import lax
from jax.experimental import pallas as pl
from jax.experimental.pallas import tpu as pltpu

DROP_P = 0.2
KEEP_SCALE = 1.0 / (1.0 - DROP_P)
# 16-bit keep threshold: element is dropped iff its hash field < DROP_THRESH16.
DROP_THRESH16 = int(round(DROP_P * 65536))   # 13107  (p_drop = 0.1999969...)

# Integer-hash constants (as signed 32-bit Python ints -> jaxpr literals).
_GOLD = -1640531535      # 0x9E3779B1
_K1 = 2146121005         # 0x7FEB352D
_K2 = -2073590133        # 0x846CA68B


def _simple_model_kernel(seed_ref, x_ref, w1_ref, b1_ref, wp_ref, bp_ref,
                         w2_ref, b2_ref, o_ref):
    """One batch tile, fully resident in VMEM.

    seed_ref : SMEM (1,) int32        -- dropout seed (scalar prefetch)
    x_ref    : VMEM (TB, D)    bf16   -- flattened input tile
    w1_ref   : VMEM (D, Hd)    bf16   -- l1 weight, pre-scaled by 1/(1-p)
    b1_ref   : VMEM (1, Hd)    f32
    wp_ref   : VMEM (D, Hd)    bf16   -- p1 weight, pre-scaled by 1/(1-p)
    bp_ref   : VMEM (1, Hd)    f32
    w2_ref   : VMEM (2*Hd, 2)  bf16   -- l2 weight (pre-transposed)
    b2_ref   : VMEM (1, 2)     f32
    o_ref    : VMEM (TB, 2)    f32
    """
    tb, d = x_ref.shape
    x = x_ref[...]                                      # (TB, D) bf16

    # --- portable per-element hash -> two independent 16-bit dropout fields ---
    row = lax.broadcasted_iota(jnp.int32, (tb, d), 0)
    col = lax.broadcasted_iota(jnp.int32, (tb, d), 1)
    base = pl.program_id(0) * tb * d + seed_ref[0] * _GOLD      # scalar int32
    v = row * d + col + base
    v = v ^ ((v >> 16) & 0xFFFF)        # (>>k)&mask == logical shift for kept bits
    v = v * _K1
    v = v ^ ((v >> 15) & 0x1FFFF)
    v = v * _K2
    keep_x = (v & 0xFFFF) >= DROP_THRESH16              # gelu-branch mask
    keep_p = ((v >> 16) & 0xFFFF) >= DROP_THRESH16      # celu-branch mask

    # Dropout: 1/(1-p) rescale is already folded into w1/wp, so a pure select.
    x_drop = jnp.where(keep_x, x, 0.0)                  # bf16
    p_drop = jnp.where(keep_p, x, 0.0)                  # bf16

    # --- branch linears (bf16 operands, f32 accumulation) ---------------------
    y_x = jnp.dot(x_drop, w1_ref[...], preferred_element_type=jnp.float32) + b1_ref[...]
    y_p = jnp.dot(p_drop, wp_ref[...], preferred_element_type=jnp.float32) + bp_ref[...]

    # --- activations -----------------------------------------------------------
    # TODO(synk): PyTorch F.gelu default is the exact erf form; we use the tanh
    # approximation (<~1e-3 abs diff) since erf has no guaranteed Pallas lowering.
    c0 = 0.7978845608028654   # sqrt(2/pi)
    x_act = 0.5 * y_x * (1.0 + jnp.tanh(c0 * (y_x + 0.044715 * (y_x * y_x * y_x))))
    # celu(alpha=1): x>0 ? x : exp(x)-1   (clamp arg so the untaken branch stays finite)
    p_act = jnp.where(y_p > 0.0, y_p, jnp.exp(jnp.minimum(y_p, 0.0)) - 1.0)

    # --- head: l2(cat(x, p)) ----------------------------------------------------
    h = jnp.concatenate([x_act, p_act], axis=-1).astype(jnp.bfloat16)   # (TB, 2*Hd)
    out = jnp.dot(h, w2_ref[...], preferred_element_type=jnp.float32) + b2_ref[...]
    o_ref[...] = out.astype(o_ref.dtype)


@jax.jit
def simple_model_forward(x_nchw, params, seed):
    """params: dict with pre-transposed weights [in, out] and biases."""
    b = x_nchw.shape[0]
    # torch.flatten(start_dim=1); bf16 to halve the dominant (x) HBM stream.
    x_flat = x_nchw.reshape(b, -1).astype(jnp.bfloat16)
    d = x_flat.shape[1]
    hd = params["w1"].shape[1]

    # Fold dropout's 1/(1-p) rescale into the branch weights (bias untouched).
    w1 = (params["w1"] * KEEP_SCALE).astype(jnp.bfloat16)
    wp = (params["wp"] * KEEP_SCALE).astype(jnp.bfloat16)
    w2 = params["w2"].astype(jnp.bfloat16)
    b1 = params["b1"].reshape(1, -1).astype(jnp.float32)
    bp = params["bp"].reshape(1, -1).astype(jnp.float32)
    b2 = params["b2"].reshape(1, -1).astype(jnp.float32)

    # Batch tiling: one tile for small batches; 512-row tiles on a padded cdiv
    # grid otherwise (robust for any B, shards across TCs via "parallel").
    if b <= 512:
        tile_b, padded_b = b, b
    else:
        tile_b = 512
        padded_b = pl.cdiv(b, tile_b) * tile_b
        if padded_b != b:
            x_flat = jnp.pad(x_flat, ((0, padded_b - b), (0, 0)))
    grid = (padded_b // tile_b,)

    out = pl.pallas_call(
        _simple_model_kernel,
        out_shape=jax.ShapeDtypeStruct((padded_b, 2), jnp.float32),
        grid_spec=pltpu.PrefetchScalarGridSpec(
            num_scalar_prefetch=1,                          # seed lands in SMEM
            grid=grid,
            in_specs=[
                pl.BlockSpec((tile_b, d), lambda i, s: (i, 0)),   # x tile
                pl.BlockSpec((d, hd), lambda i, s: (0, 0)),       # l1 W
                pl.BlockSpec((1, hd), lambda i, s: (0, 0)),       # l1 b
                pl.BlockSpec((d, hd), lambda i, s: (0, 0)),       # p1 W
                pl.BlockSpec((1, hd), lambda i, s: (0, 0)),       # p1 b
                pl.BlockSpec((2 * hd, 2), lambda i, s: (0, 0)),   # l2 W
                pl.BlockSpec((1, 2), lambda i, s: (0, 0)),        # l2 b
            ],
            out_specs=pl.BlockSpec((tile_b, 2), lambda i, s: (i, 0)),
        ),
        compiler_params=pltpu.CompilerParams(
            dimension_semantics=("parallel",),       # shard batch tiles across TCs
            vmem_limit_bytes=48 * 1024 * 1024,       # headroom for 512-row tiles
        ),
    )(jnp.full((1,), seed, jnp.int32), x_flat, w1, b1, wp, bp, w2, b2)

    return out[:b]


def init_params(key, input_dim, hidden_dim):
    """Deterministic init matching nn.Linear's U(-1/sqrt(fan_in), 1/sqrt(fan_in))."""
    ks = jax.random.split(key, 6)

    def lin(kw, kb, fan_in, fan_out):
        bound = 1.0 / (fan_in ** 0.5)
        w = jax.random.uniform(kw, (fan_in, fan_out), jnp.float32, -bound, bound)
        b = jax.random.uniform(kb, (fan_out,), jnp.float32, -bound, bound)
        return w, b

    w1, b1 = lin(ks[0], ks[1], input_dim, hidden_dim)
    wp, bp = lin(ks[2], ks[3], input_dim, hidden_dim)
    w2, b2 = lin(ks[4], ks[5], hidden_dim * 2, 2)
    return {"w1": w1, "b1": b1, "wp": wp, "bp": bp, "w2": w2, "b2": b2}


if __name__ == "__main__":
    key = jax.random.PRNGKey(0)
    k_x, k_p = jax.random.split(key)

    B, C, H, W = 2, 4, 16, 16
    HIDDEN = 32
    INPUT_DIM = C * H * W  # 1024

    x = jax.random.normal(k_x, (B, C, H, W), dtype=jnp.float32)
    params = init_params(k_p, INPUT_DIM, HIDDEN)

    out = simple_model_forward(x, params, seed=0)
    out = jax.block_until_ready(out)

    assert out.shape == (B, 2), out.shape
    assert bool(jnp.all(jnp.isfinite(out)))
    print("KERNEL_OK")
</pallas_src>

<mosaic_0001>
module attributes {stable_mosaic.version = 11 : i64} {
  func.func @_simple_model_kernel(%arg0: i32, %arg1: memref<1xi32, #tpu.memory_space<smem>>, %arg2: memref<2x1024xbf16, #tpu.memory_space<vmem>>, %arg3: memref<1024x32xbf16, #tpu.memory_space<vmem>>, %arg4: memref<1x32xf32, #tpu.memory_space<vmem>>, %arg5: memref<1024x32xbf16, #tpu.memory_space<vmem>>, %arg6: memref<1x32xf32, #tpu.memory_space<vmem>>, %arg7: memref<64x2xbf16, #tpu.memory_space<vmem>>, %arg8: memref<1x2xf32, #tpu.memory_space<vmem>>, %arg9: memref<2x2xf32, #tpu.memory_space<vmem>>) attributes {dimension_semantics = [#tpu.dimension_semantics<parallel>], iteration_bounds = array<i64: 1>, scalar_prefetch = 1 : i64, scratch_operands = 0 : i64, tpu.core_type = #tpu.core_type<tc>, window_params = [{transform_indices = @transform_0, window_bounds = array<i64: 2, 1024>}, {pipeline_mode = #tpu.pipeline_mode<synchronous>, transform_indices = @transform_1, window_bounds = array<i64: 1024, 32>}, {pipeline_mode = #tpu.pipeline_mode<synchronous>, transform_indices = @transform_2, window_bounds = array<i64: 1, 32>}, {pipeline_mode = #tpu.pipeline_mode<synchronous>, transform_indices = @transform_3, window_bounds = array<i64: 1024, 32>}, {pipeline_mode = #tpu.pipeline_mode<synchronous>, transform_indices = @transform_4, window_bounds = array<i64: 1, 32>}, {pipeline_mode = #tpu.pipeline_mode<synchronous>, transform_indices = @transform_5, window_bounds = array<i64: 64, 2>}, {pipeline_mode = #tpu.pipeline_mode<synchronous>, transform_indices = @transform_6, window_bounds = array<i64: 1, 2>}, {transform_indices = @transform_7, window_bounds = array<i64: 2, 2>}]} {
    %c0 = arith.constant 0 : index
    %c0_0 = arith.constant 0 : index
    %0 = vector.load %arg2[%c0, %c0_0] : memref<2x1024xbf16, #tpu.memory_space<vmem>>, vector<2x1024xbf16>
    %1 = tpu.iota {dimensions = array<i32: 0>} : vector<2x1024xi32>
    %2 = tpu.iota {dimensions = array<i32: 1>} : vector<2x1024xi32>
    %c2_i32 = arith.constant 2 : i32
    %3 = arith.muli %arg0, %c2_i32 : i32
    %c1024_i32 = arith.constant 1024 : i32
    %4 = arith.muli %3, %c1024_i32 : i32
    %c0_1 = arith.constant 0 : index
    %5 = memref.load %arg1[%c0_1] : memref<1xi32, #tpu.memory_space<smem>>
    %c-1640531535_i32 = arith.constant -1640531535 : i32
    %6 = arith.muli %5, %c-1640531535_i32 : i32
    %7 = arith.addi %4, %6 : i32
    %c1024_i32_2 = arith.constant 1024 : i32
    %8 = vector.broadcast %c1024_i32_2 : i32 to vector<2x1024xi32>
    %9 = arith.muli %1, %8 : vector<2x1024xi32>
    %10 = arith.addi %9, %2 : vector<2x1024xi32>
    %11 = vector.broadcast %7 : i32 to vector<2x1024xi32>
    %12 = arith.addi %10, %11 : vector<2x1024xi32>
    %c16_i32 = arith.constant 16 : i32
    %13 = vector.broadcast %c16_i32 : i32 to vector<2x1024xi32>
    %14 = arith.shrsi %12, %13 : vector<2x1024xi32>
    %c65535_i32 = arith.constant 65535 : i32
    %15 = vector.broadcast %c65535_i32 : i32 to vector<2x1024xi32>
    %16 = arith.andi %14, %15 : vector<2x1024xi32>
    %17 = arith.xori %12, %16 : vector<2x1024xi32>
    %c2146121005_i32 = arith.constant 2146121005 : i32
    %18 = vector.broadcast %c2146121005_i32 : i32 to vector<2x1024xi32>
    %19 = arith.muli %17, %18 : vector<2x1024xi32>
    %c15_i32 = arith.constant 15 : i32
    %20 = vector.broadcast %c15_i32 : i32 to vector<2x1024xi32>
    %21 = arith.shrsi %19, %20 : vector<2x1024xi32>
    %c131071_i32 = arith.constant 131071 : i32
    %22 = vector.broadcast %c131071_i32 : i32 to vector<2x1024xi32>
    %23 = arith.andi %21, %22 : vector<2x1024xi32>
    %24 = arith.xori %19, %23 : vector<2x1024xi32>
    %c-2073590133_i32 = arith.constant -2073590133 : i32
    %25 = vector.broadcast %c-2073590133_i32 : i32 to vector<2x1024xi32>
    %26 = arith.muli %24, %25 : vector<2x1024xi32>
    %c65535_i32_3 = arith.constant 65535 : i32
    %27 = vector.broadcast %c65535_i32_3 : i32 to vector<2x1024xi32>
    %28 = arith.andi %26, %27 : vector<2x1024xi32>
    %c13107_i32 = arith.constant 13107 : i32
    %29 = vector.broadcast %c13107_i32 : i32 to vector<2x1024xi32>
    %30 = arith.cmpi sge, %28, %29 : vector<2x1024xi32>
    %c16_i32_4 = arith.constant 16 : i32
    %31 = vector.broadcast %c16_i32_4 : i32 to vector<2x1024xi32>
    %32 = arith.shrsi %26, %31 : vector<2x1024xi32>
    %c65535_i32_5 = arith.constant 65535 : i32
    %33 = vector.broadcast %c65535_i32_5 : i32 to vector<2x1024xi32>
    %34 = arith.andi %32, %33 : vector<2x1024xi32>
    %c13107_i32_6 = arith.constant 13107 : i32
    %35 = vector.broadcast %c13107_i32_6 : i32 to vector<2x1024xi32>
    %36 = arith.cmpi sge, %34, %35 : vector<2x1024xi32>
    %cst = arith.constant 0.000000e+00 : f32
    %37 = arith.truncf %cst : f32 to bf16
    %38 = vector.broadcast %37 : bf16 to vector<2x1024xbf16>
    %39 = arith.select %30, %0, %38 : vector<2x1024xi1>, vector<2x1024xbf16>
    %cst_7 = arith.constant 0.000000e+00 : f32
    %40 = arith.truncf %cst_7 : f32 to bf16
    %41 = vector.broadcast %40 : bf16 to vector<2x1024xbf16>
    %42 = arith.select %36, %0, %41 : vector<2x1024xi1>, vector<2x1024xbf16>
    %c0_8 = arith.constant 0 : index
    %c0_9 = arith.constant 0 : index
    %43 = vector.load %arg3[%c0_8, %c0_9] : memref<1024x32xbf16, #tpu.memory_space<vmem>>, vector<1024x32xbf16>
    %cst_10 = arith.constant dense<0.000000e+00> : vector<2x32xf32>
    %44 = tpu.matmul %39, %43, %cst_10 {dimension_numbers = #tpu.dot_dimension_numbers<[1], [0], [0], [1], [0, 0, 1, 1], [], []>} : vector<2x1024xbf16>, vector<1024x32xbf16>, vector<2x32xf32> -> vector<2x32xf32>
    %c0_11 = arith.constant 0 : index
    %c0_12 = arith.constant 0 : index
    %45 = vector.load %arg4[%c0_11, %c0_12] : memref<1x32xf32, #tpu.memory_space<vmem>>, vector<1x32xf32>
    %46 = vector.broadcast %45 : vector<1x32xf32> to vector<2x32xf32>
    %47 = arith.addf %44, %46 : vector<2x32xf32>
    %c0_13 = arith.constant 0 : index
    %c0_14 = arith.constant 0 : index
    %48 = vector.load %arg5[%c0_13, %c0_14] : memref<1024x32xbf16, #tpu.memory_space<vmem>>, vector<1024x32xbf16>
    %cst_15 = arith.constant dense<0.000000e+00> : vector<2x32xf32>
    %49 = tpu.matmul %42, %48, %cst_15 {dimension_numbers = #tpu.dot_dimension_numbers<[1], [0], [0], [1], [0, 0, 1, 1], [], []>} : vector<2x1024xbf16>, vector<1024x32xbf16>, vector<2x32xf32> -> vector<2x32xf32>
    %c0_16 = arith.constant 0 : index
    %c0_17 = arith.constant 0 : index
    %50 = vector.load %arg6[%c0_16, %c0_17] : memref<1x32xf32, #tpu.memory_space<vmem>>, vector<1x32xf32>
    %51 = vector.broadcast %50 : vector<1x32xf32> to vector<2x32xf32>
    %52 = arith.addf %49, %51 : vector<2x32xf32>
    %cst_18 = arith.constant 5.000000e-01 : f32
    %53 = vector.broadcast %cst_18 : f32 to vector<2x32xf32>
    %54 = arith.mulf %53, %47 : vector<2x32xf32>
    %55 = arith.mulf %47, %47 : vector<2x32xf32>
    %56 = arith.mulf %55, %47 : vector<2x32xf32>
    %cst_19 = arith.constant 4.471500e-02 : f32
    %57 = vector.broadcast %cst_19 : f32 to vector<2x32xf32>
    %58 = arith.mulf %57, %56 : vector<2x32xf32>
    %59 = arith.addf %47, %58 : vector<2x32xf32>
    %cst_20 = arith.constant 0.797884583 : f32
    %60 = vector.broadcast %cst_20 : f32 to vector<2x32xf32>
    %61 = arith.mulf %60, %59 : vector<2x32xf32>
    %62 = math.tanh %61 : vector<2x32xf32>
    %cst_21 = arith.constant 1.000000e+00 : f32
    %63 = vector.broadcast %cst_21 : f32 to vector<2x32xf32>
    %64 = arith.addf %63, %62 : vector<2x32xf32>
    %65 = arith.mulf %54, %64 : vector<2x32xf32>
    %cst_22 = arith.constant 0.000000e+00 : f32
    %66 = vector.broadcast %cst_22 : f32 to vector<2x32xf32>
    %67 = arith.cmpf ogt, %52, %66 : vector<2x32xf32>
    %cst_23 = arith.constant 0.000000e+00 : f32
    %68 = vector.broadcast %cst_23 : f32 to vector<2x32xf32>
    %69 = arith.minimumf %52, %68 : vector<2x32xf32>
    %70 = math.exp %69 : vector<2x32xf32>
    %cst_24 = arith.constant 1.000000e+00 : f32
    %71 = vector.broadcast %cst_24 : f32 to vector<2x32xf32>
    %72 = arith.subf %70, %71 : vector<2x32xf32>
    %73 = arith.select %67, %52, %72 : vector<2x32xi1>, vector<2x32xf32>
    %74 = tpu.concatenate %65, %73 in 1 : vector<2x32xf32>, vector<2x32xf32> -> vector<2x64xf32>
    %75 = arith.truncf %74 : vector<2x64xf32> to vector<2x64xbf16>
    %c0_25 = arith.constant 0 : index
    %c0_26 = arith.constant 0 : index
    %76 = vector.load %arg7[%c0_25, %c0_26] : memref<64x2xbf16, #tpu.memory_space<vmem>>, vector<64x2xbf16>
    %cst_27 = arith.constant dense<0.000000e+00> : vector<2x2xf32>
    %77 = tpu.matmul %75, %76, %cst_27 {dimension_numbers = #tpu.dot_dimension_numbers<[1], [0], [0], [1], [0, 0, 1, 1], [], []>} : vector<2x64xbf16>, vector<64x2xbf16>, vector<2x2xf32> -> vector<2x2xf32>
    %c0_28 = arith.constant 0 : index
    %c0_29 = arith.constant 0 : index
    %78 = vector.load %arg8[%c0_28, %c0_29] : memref<1x2xf32, #tpu.memory_space<vmem>>, vector<1x2xf32>
    %79 = vector.broadcast %78 : vector<1x2xf32> to vector<2x2xf32>
    %80 = arith.addf %77, %79 : vector<2x2xf32>
    %c0_30 = arith.constant 0 : index
    %c0_31 = arith.constant 0 : index
    %81 = vector.load %arg9[%c0_30, %c0_31] : memref<2x2xf32, #tpu.memory_space<vmem>>, vector<2x2xf32>
    tpu.vector_store %arg9[%c0_30, %c0_31], %80 {strides = array<i32>} : memref<2x2xf32, #tpu.memory_space<vmem>>, vector<2x2xf32>,
    return
  }
  func.func @transform_0(%arg0: i32, %arg1: memref<1xi32, #tpu.memory_space<smem>>) -> (i32, i32) {
    %c0_i32 = arith.constant 0 : i32
    %c0_i32_0 = arith.constant 0 : i32
    return %arg0, %c0_i32 : i32, i32
  }
  func.func @transform_1(%arg0: i32, %arg1: memref<1xi32, #tpu.memory_space<smem>>) -> (i32, i32) {
    %c0_i32 = arith.constant 0 : i32
    %c0_i32_0 = arith.constant 0 : i32
    %c0_i32_1 = arith.constant 0 : i32
    return %c0_i32, %c0_i32_0 : i32, i32
  }
  func.func @transform_2(%arg0: i32, %arg1: memref<1xi32, #tpu.memory_space<smem>>) -> (i32, i32) {
    %c0_i32 = arith.constant 0 : i32
    %c0_i32_0 = arith.constant 0 : i32
    %c0_i32_1 = arith.constant 0 : i32
    return %c0_i32, %c0_i32_0 : i32, i32
  }
  func.func @transform_3(%arg0: i32, %arg1: memref<1xi32, #tpu.memory_space<smem>>) -> (i32, i32) {
    %c0_i32 = arith.constant 0 : i32
    %c0_i32_0 = arith.constant 0 : i32
    %c0_i32_1 = arith.constant 0 : i32
    return %c0_i32, %c0_i32_0 : i32, i32
  }
  func.func @transform_4(%arg0: i32, %arg1: memref<1xi32, #tpu.memory_space<smem>>) -> (i32, i32) {
    %c0_i32 = arith.constant 0 : i32
    %c0_i32_0 = arith.constant 0 : i32
    %c0_i32_1 = arith.constant 0 : i32
    return %c0_i32, %c0_i32_0 : i32, i32
  }
  func.func @transform_5(%arg0: i32, %arg1: memref<1xi32, #tpu.memory_space<smem>>) -> (i32, i32) {
    %c0_i32 = arith.constant 0 : i32
    %c0_i32_0 = arith.constant 0 : i32
    %c0_i32_1 = arith.constant 0 : i32
    return %c0_i32, %c0_i32_0 : i32, i32
  }
  func.func @transform_6(%arg0: i32, %arg1: memref<1xi32, #tpu.memory_space<smem>>) -> (i32, i32) {
    %c0_i32 = arith.constant 0 : i32
    %c0_i32_0 = arith.constant 0 : i32
    %c0_i32_1 = arith.constant 0 : i32
    return %c0_i32, %c0_i32_0 : i32, i32
  }
  func.func @transform_7(%arg0: i32, %arg1: memref<1xi32, #tpu.memory_space<smem>>) -> (i32, i32) {
    %c0_i32 = arith.constant 0 : i32
    %c0_i32_0 = arith.constant 0 : i32
    return %arg0, %c0_i32 : i32, i32
  }
}

</mosaic_0001>

<bundles_post_ra>
// kernel: simple_model_forward.1
= control target key start
LH: loop header
LB: loop body
LE: loop exit
PB: predicated region body
PF: predicated region fallthrough
CT: control target
= control target key end

     0   :  { %v32_v14 = vlaneseq  ;;  %s2931_s0 = inlined_call_operand.<no memory space> [shape: s32[1], index: 0, kind: input, shape index: {}]   ;;  %s2932_s1 = inlined_call_operand.vmem [shape: bf16[2,1024], index: 1, kind: input, shape index: {}]   ;;  %s2933_s2 = inlined_call_operand.vmem [shape: bf16[1024,32], index: 2, kind: input, shape index: {}]   ;;  %s2934_s3 = inlined_call_operand.vmem [shape: f32[1,32], index: 3, kind: input, shape index: {}]   ;;  %s2935_s4 = inlined_call_operand.vmem [shape: bf16[1024,32], index: 4, kind: input, shape index: {}]   ;;  %s2936_s5 = inlined_call_operand.vmem [shape: f32[1,32], index: 5, kind: input, shape index: {}]   ;;  %s2937_s6 = inlined_call_operand.vmem [shape: bf16[64,2], index: 6, kind: input, shape index: {}]   ;;  %s2938_s7 = inlined_call_operand.vmem [shape: f32[1,2], index: 7, kind: input, shape index: {}]   ;;  %s2939_s8 = inlined_call_operand.hbm [shape: f32[2,2], index: 8, kind: output, shape index: {}]  }
   0x1   :  { %v2223_v0 = vld [vmem:[%s2933_s2 + $0x78] sm:$0xff]   ;;  %v2227_v4 = vld [vmem:[%s2933_s2 + $0x70] sm:$0xff]   ;;  %v2231_v8 = vld [vmem:[%s2933_s2 + $0x68] sm:$0xff]   ;;  %s45_s27 = smul.u32 2654435761, %s2931_s0 }
   0x2   :  { %v2224_v1 = vld [vmem:[%s2933_s2 + $0x38] sm:$0xff]   ;;  %2023 = vmatprep.subr.bf16.mxu0 %v2223_v0  ;;  %v2228_v5 = vld [vmem:[%s2933_s2 + $0x30] sm:$0xff]   ;;  %v2232_v9 = vld [vmem:[%s2933_s2 + $0x28] sm:$0xff]   ;;  %v2487_v19 = vshrl.u32 %v32_v14, 7  ;;  %v35_v21 = vand.u32 127, %v32_v14 }
   0x3   :  { %v2225_v2 = vld [vmem:[%s2933_s2 + $0xf8] sm:$0xff]   ;;  %2024 = vmatpush3.bf16.msra.mxu0 %v2224_v1  ;;  %v2229_v6 = vld [vmem:[%s2933_s2 + $0xf0] sm:$0xff]   ;;  %v2233_v10 = vld [vmem:[%s2933_s2 + $0xe8] sm:$0xff]   ;;  %v56_v52 = vstv %s45_s27 }
   0x4   :  { %v2226_v3 = vld [vmem:[%s2933_s2 + $0xb8] sm:$0xff]   ;;  %2045 = vmatprep.subr.bf16.mxu1 %v2225_v2  ;;  %2025 = vmatprep.subr.bf16.mxu0 %v2227_v4  ;;  %v2230_v7 = vld [vmem:[%s2933_s2 + $0xb0] sm:$0xff]   ;;  %v2234_v11 = vld [vmem:[%s2933_s2 + $0xa8] sm:$0xff]   ;;  %v47_v25 = vmul.u32 1024, %v2487_v19  ;;  %v36_v27 = vadd.s32 128, %v35_v21  ;;  %v37_v29 = vadd.s32 256, %v35_v21 }
   0x5   :  { %2046 = vmatpush3.bf16.msra.mxu1 %v2226_v3  ;;  %v2235_v12 = vld [vmem:[%s2933_s2 + $0x60] sm:$0xff]   ;;  %v2239_v17 = vld [vmem:[%s2933_s2 + $0x58] sm:$0xff]   ;;  %v2243_v23 = vld [vmem:[%s2933_s2 + $0x50] sm:$0xff]   ;;  %v38_v31 = vadd.s32 384, %v35_v21  ;;  %v39_v33 = vadd.s32 512, %v35_v21  ;;  %v40_v35 = vadd.s32 640, %v35_v21 }
   0x6   :  { %2047 = vmatprep.subr.bf16.mxu1 %v2229_v6  ;;  %v2236_v13 = vld [vmem:[%s2933_s2 + $0x20] sm:$0xff]   ;;  %v2240_v18 = vld [vmem:[%s2933_s2 + $0x18] sm:$0xff]   ;;  %v2244_v24 = vld [vmem:[%s2933_s2 + $0x10] sm:$0xff]   ;;  %v41_v37 = vadd.s32 768, %v35_v21  ;;  %v42_v39 = vadd.s32 896, %v35_v21  ;;  %v48_v43 = vadd.s32 %v47_v25, %v35_v21  ;;  %v49_v44 = vadd.s32 %v47_v25, %v36_v27 }
   0x7   :  { %2026 = vmatpush3.bf16.msra.mxu0 %v2228_v5  ;;  %v2237_v15 = vld [vmem:[%s2933_s2 + $0xe0] sm:$0xff]   ;;  %v2241_v20 = vld [vmem:[%s2933_s2 + $0xd8] sm:$0xff]   ;;  %v2245_v26 = vld [vmem:[%s2933_s2 + $0xd0] sm:$0xff]   ;;  %v50_v45 = vadd.s32 %v47_v25, %v37_v29  ;;  %v51_v46 = vadd.s32 %v47_v25, %v38_v31  ;;  %v52_v47 = vadd.s32 %v47_v25, %v39_v33  ;;  %v53_v48 = vadd.s32 %v47_v25, %v40_v35 }
   0x8   :  { %2027 = vmatprep.subr.bf16.mxu0 %v2231_v8  ;;  %v2238_v16 = vld [vmem:[%s2933_s2 + $0xa0] sm:$0xff]   ;;  %v2242_v22 = vld [vmem:[%s2933_s2 + $0x98] sm:$0xff]   ;;  %v2246_v28 = vld [vmem:[%s2933_s2 + $0x90] sm:$0xff]   ;;  %v54_v49 = vadd.s32 %v47_v25, %v41_v37  ;;  %v55_v50 = vadd.s32 %v47_v25, %v42_v39  ;;  %v57_v53 = vadd.s32 %v56_v52, %v48_v43  ;;  %v58_v54 = vadd.s32 %v56_v52, %v49_v44 }
   0x9   :  { %2048 = vmatpush3.bf16.msra.mxu1 %v2230_v7  ;;  %v2247_v30 = vld [vmem:[%s2933_s2 + $0x48] sm:$0xff]   ;;  %v2251_v38 = vld [vmem:[%s2933_s2 + $0x40] sm:$0xff]   ;;  %v2255_v51 = vld [vmem:[%s2933_s2 + $0x178] sm:$0xff]   ;;  %v59_v55 = vadd.s32 %v56_v52, %v50_v45  ;;  %v60_v56 = vadd.s32 %v56_v52, %v51_v46  ;;  %v61_v58 = vadd.s32 %v56_v52, %v52_v47  ;;  %v62_v59 = vadd.s32 %v56_v52, %v53_v48 }
   0xa   :  { %2049 = vmatprep.subr.bf16.mxu1 %v2233_v10  ;;  %v2248_v32 = vld [vmem:[%s2933_s2 + $0x8] sm:$0xff]   ;;  %v2252_v40 = vld [vmem:[%s2933_s2] sm:$0xff]   ;;  %v2257_v57 = vld [vmem:[%s2933_s2 + $0x1f8] sm:$0xff]   ;;  %v63_v60 = vadd.s32 %v56_v52, %v54_v49  ;;  %v64_v61 = vadd.s32 %v56_v52, %v55_v50  ;;  %v1862_v62 = vshrl.u32 %v57_v53, 16  ;;  %v1863_v63 = vshrl.u32 %v58_v54, 16 }
   0xb   :  { %2028 = vmatpush3.bf16.msra.mxu0 %v2232_v9  ;;  %v2249_v34 = vld [vmem:[%s2933_s2 + $0xc8] sm:$0xff]   ;;  %v2253_v41 = vld [vmem:[%s2933_s2 + $0xc0] sm:$0xff]   ;;  %v1864_v0 = vshrl.u32 %v59_v55, 16  ;;  %v1865_v1 = vshrl.u32 %v60_v56, 16  ;;  %v1866_v2 = vshrl.u32 %v61_v58, 16  ;;  %v1867_v3 = vshrl.u32 %v62_v59, 16 }
   0xc   :  { %2029 = vmatprep.subr.bf16.mxu0 %v2235_v12  ;;  %v2250_v36 = vld [vmem:[%s2933_s2 + $0x88] sm:$0xff]   ;;  %v2254_v42 = vld [vmem:[%s2933_s2 + $0x80] sm:$0xff]   ;;  %v1868_v4 = vshrl.u32 %v63_v60, 16  ;;  %v1869_v5 = vshrl.u32 %v64_v61, 16  ;;  %v81_v6 = vxor.u32 %v1862_v62, %v57_v53  ;;  %v82_v7 = vxor.u32 %v1863_v63, %v58_v54 }
   0xd   :  { %2050 = vmatpush3.bf16.msra.mxu1 %v2234_v11  ;;  %v83_v8 = vxor.u32 %v1864_v0, %v59_v55  ;;  %v84_v9 = vxor.u32 %v1865_v1, %v60_v56  ;;  %v85_v10 = vxor.u32 %v1866_v2, %v61_v58  ;;  %v86_v11 = vxor.u32 %v1867_v3, %v62_v59 }
   0xe   :  { %2051 = vmatprep.subr.bf16.mxu1 %v2237_v15  ;;  %v87_v12 = vxor.u32 %v1868_v4, %v63_v60  ;;  %v89_v14 = vmul.u32 2146121005, %v81_v6  ;;  %v90_v15 = vmul.u32 2146121005, %v82_v7  ;;  %v2383_v4 = vmov 0  }
   0xf   :  { %2030 = vmatpush3.bf16.msra.mxu0 %v2236_v13  ;;  %v88_v13 = vxor.u32 %v1869_v5, %v64_v61  ;;  %v93_v21 = vmul.u32 2146121005, %v85_v10 }
  0x10   :  { %2031 = vmatprep.subr.bf16.mxu0 %v2239_v17  ;;  %v92_v17 = vmul.u32 2146121005, %v84_v9  ;;  %v95_v25 = vmul.u32 2146121005, %v87_v12 }
  0x11   :  { %2052 = vmatpush3.bf16.msra.mxu1 %v2238_v16  ;;  %v91_v16 = vmul.u32 2146121005, %v83_v8  ;;  %v1874_v29 = vshrl.u32 %v93_v21, 15 }
  0x12   :  { %2053 = vmatprep.subr.bf16.mxu1 %v2241_v20  ;;  %v1876_v33 = vshrl.u32 %v95_v25, 15 }
  0x13   :  { %2032 = vmatpush3.bf16.msra.mxu0 %v2240_v18  ;;  %v2381_v18 = vmov 1983009808   ;;  %v1872_v27 = vshrl.u32 %v91_v16, 15  ;;  %v117_v37 = vxor.u32 %v1874_v29, %v93_v21 }
  0x14   :  { %2033 = vmatprep.subr.bf16.mxu0 %v2243_v23  ;;  %v2541_v20 = vunpack.c.l.s4 %v2381_v18  ;;  %v1870_v23 = vshrl.u32 %v89_v14, 15 }
  0x15   :  { %2054 = vmatpush3.bf16.msra.mxu1 %v2242_v22  ;;  %v94_v22 = vmul.u32 2146121005, %v86_v11  ;;  %v115_v35 = vxor.u32 %v1872_v27, %v91_v16  ;;  %v125_v45 = vmul.u32 2221377163, %v117_v37 }
  0x16   :  { %2055 = vmatprep.subr.bf16.mxu1 %v2245_v26  ;;  %v96_v26 = vmul.u32 2146121005, %v88_v13  ;;  %v113_v31 = vxor.u32 %v1870_v23, %v89_v14  ;;  %v181_v61 = vunpack.c.0.s8 %v2541_v20 }
  0x17   :  { %2034 = vmatpush3.bf16.msra.mxu0 %v2244_v24  ;;  %v1871_v24 = vshrl.u32 %v90_v15, 15  ;;  %v123_v43 = vmul.u32 2221377163, %v115_v35  ;;  %v133_v53 = vand.u32 65535, %v125_v45  ;;  %v1882_v0 = vshrl.u32 %v125_v45, 16 }
  0x18   :  { %2035 = vmatprep.subr.bf16.mxu0 %v2247_v30  ;;  %v1875_v30 = vshrl.u32 %v94_v22, 15  ;;  %v121_v39 = vmul.u32 2221377163, %v113_v31 }
  0x19   :  { %2056 = vmatpush3.bf16.msra.mxu1 %v2246_v28  ;;  %v1873_v28 = vshrl.u32 %v92_v17, 15  ;;  %v1880_v62 = vshrl.u32 %v123_v43, 16  ;;  %vm141_vm4 = vcmp.ge.s32.totalorder %v133_v53, 13107  ;;  %vm165_vm12 = vcmp.ge.s32.totalorder %v1882_v0, 13107  ;;  %v2262_v0 = vld [vmem:[%s2933_s2 + $0x1b0] sm:$0xff]  }
  0x1a   :  { %2057 = vmatprep.subr.bf16.mxu1 %v2249_v34  ;;  %v1877_v34 = vshrl.u32 %v96_v26, 15  ;;  %v129_v47 = vand.u32 65535, %v121_v39  ;;  %v1878_v59 = vshrl.u32 %v121_v39, 16  ;;  %v173_v9 = vsel %vm141_vm4, 1, %v2383_v4 }
  0x1b   :  { %2036 = vmatpush3.bf16.msra.mxu0 %v2248_v32  ;;  %v114_v32 = vxor.u32 %v1871_v24, %v90_v15  ;;  %vm163_vm10 = vcmp.ge.s32.totalorder %v1880_v62, 13107  ;;  %v184_v15 = vsub.s32 %v181_v61, %v2487_v19  ;;  %v222_v29 = vsel %vm165_vm12, 1, %v2383_v4  ;;  %v2260_v61 = vld [vmem:[%s2933_s2 + $0x130] sm:$0xff]  }
  0x1c   :  { %2037 = vmatprep.subr.bf16.mxu0 %v2251_v38  ;;  %v118_v38 = vxor.u32 %v1875_v30, %v94_v22  ;;  %vm137_vm0 = vcmp.ge.s32.totalorder %v129_v47, 13107  ;;  %vm161_vm8 = vcmp.ge.s32.totalorder %v1878_v59, 13107 }
  0x1d   :  { %2058 = vmatpush3.bf16.msra.mxu1 %v2250_v36  ;;  %v116_v36 = vxor.u32 %v1873_v28, %v92_v17  ;;  %v169_v5 = vsel %vm137_vm0, 1, %v2383_v4  ;;  %v218_v23 = vsel %vm161_vm8, 1, %v2383_v4 }
  0x1e   :  { %2059 = vmatprep.subr.bf16.mxu1 %v2253_v41  ;;  %v119_v41 = vxor.u32 %v1876_v33, %v95_v25  ;;  %v126_v46 = vmul.u32 2221377163, %v118_v38 }
  0x1f   :  { %2038 = vmatpush3.bf16.msra.mxu0 %v2252_v40  ;;  %v122_v40 = vmul.u32 2221377163, %v114_v32  ;;  %v124_v44 = vmul.u32 2221377163, %v116_v36  ;;  %v2579_v36 = vld [vmem:[%s2932_s1] sm:$0xff] }
  0x20   :  { %2067 = vmatprep.subr.bf16.mxu0 %v2255_v51  ;;  %v127_v49 = vmul.u32 2221377163, %v119_v41  ;;  %v131_v51 = vand.u32 65535, %v123_v43  ;;  %v134_v54 = vand.u32 65535, %v126_v46  ;;  %v1883_v1 = vshrl.u32 %v126_v46, 16 }
  0x21   :  { %2060 = vmatpush3.bf16.msra.mxu1 %v2254_v42  ;;  %v120_v42 = vxor.u32 %v1877_v34, %v96_v26  ;;  %v130_v48 = vand.u32 65535, %v122_v40  ;;  %v132_v52 = vand.u32 65535, %v124_v44  ;;  %v1879_v60 = vshrl.u32 %v122_v40, 16 }
  0x22   :  { %2089 = vmatprep.subr.bf16.mxu1 %v2257_v57  ;;  %v135_v55 = vand.u32 65535, %v127_v49  ;;  %v2382_v57 = vmov 1966171168   ;;  %vm139_vm2 = vcmp.ge.s32.totalorder %v131_v51, 13107  ;;  %vm142_vm5 = vcmp.ge.s32.totalorder %v134_v54, 13107  ;;  %v2258_v54 = vld [vmem:[%s2933_s2 + $0x1b8] sm:$0xff]  }
  0x23   :  { %v128_v50 = vmul.u32 2221377163, %v120_v42  ;;  %v405_v58 = vunpack.c.l.s4 %v2382_v57  ;;  %vm138_vm1 = vcmp.ge.s32.totalorder %v130_v48, 13107  ;;  %vm140_vm3 = vcmp.ge.s32.totalorder %v132_v52, 13107  ;;  %v2256_v52 = vld [vmem:[%s2933_s2 + $0x138] sm:$0xff]   ;;  %v2259_v57 = vld [vmem:[%s2933_s2 + $0x170] sm:$0xff]  }
  0x24   :  { %vm143_vm6 = vcmp.ge.s32.totalorder %v135_v55, 13107  ;;  %v1881_v63 = vshrl.u32 %v124_v44, 16  ;;  %v1884_v2 = vshrl.u32 %v127_v49, 16  ;;  %vm162_vm9 = vcmp.ge.s32.totalorder %v1879_v60, 13107 }
  0x25   :  { %v136_v56 = vand.u32 65535, %v128_v50  ;;  %v1885_v3 = vshrl.u32 %v128_v50, 16  ;;  %v170_v6 = vsel %vm138_vm1, 1, %v2383_v4  ;;  %v171_v7 = vsel %vm139_vm2, 1, %v2383_v4 }
  0x26   :  { %v172_v8 = vsel %vm140_vm3, 1, %v2383_v4  ;;  %v174_v10 = vsel %vm142_vm5, 1, %v2383_v4  ;;  %v175_v11 = vsel %vm143_vm6, 1, %v2383_v4  ;;  %v177_v13 = vcombine.low %v169_v5, %v170_v6  ;;  %v2265_v5 = vld [vmem:[%s2933_s2 + $0x1e8] sm:$0xff]  }
  0x27   :  { %vm144_vm7 = vcmp.ge.s32.totalorder %v136_v56, 13107  ;;  %v178_v14 = vcombine.low %v171_v7, %v172_v8  ;;  %v194_v16 = vcombine.low %v173_v9, %v174_v10  ;;  %vm164_vm11 = vcmp.ge.s32.totalorder %v1881_v63, 13107  ;;  %v2261_v63 = vld [vmem:[%s2933_s2 + $0x1f0] sm:$0xff]   ;;  %v2266_v6 = vld [vmem:[%s2933_s2 + $0x1a8] sm:$0xff]   ;;  %v2267_v7 = vld [vmem:[%s2933_s2 + $0x160] sm:$0xff]  }
  0x28   :  { %v176_v12 = vsel %vm144_vm7, 1, %v2383_v4  ;;  %vm166_vm13 = vcmp.ge.s32.totalorder %v1883_v1, 13107  ;;  %vm167_vm14 = vcmp.ge.s32.totalorder %v1884_v2, 13107  ;;  %v185_v18 = vrot.slane %v177_v13, %v184_v15  ;;  %v2263_v2 = vld [vmem:[%s2933_s2 + $0x168] sm:$0xff]   ;;  %v2268_v10 = vld [vmem:[%s2933_s2 + $0x120] sm:$0xff]  }
  0x29   :  { %v195_v17 = vcombine.low %v175_v11, %v176_v12  ;;  %v192_v20 = vrot.slane %v178_v14, %v184_v15  ;;  %v202_v21 = vrot.slane %v194_v16, %v184_v15  ;;  %vm168_vm15 = vcmp.ge.s32.totalorder %v1885_v3, 13107  ;;  %v2264_v3 = vld [vmem:[%s2933_s2 + $0x128] sm:$0xff]   ;;  %v2269_v11 = vld [vmem:[%s2933_s2 + $0x1e0] sm:$0xff]   ;;  %v2272_v14 = vld [vmem:[%s2933_s2 + $0x118] sm:$0xff]  }
  0x2a   :  { %v219_v24 = vsel %vm162_vm9, 1, %v2383_v4  ;;  %v220_v26 = vsel %vm163_vm10, 1, %v2383_v4  ;;  %v221_v27 = vsel %vm164_vm11, 1, %v2383_v4  ;;  %v223_v30 = vsel %vm166_vm13, 1, %v2383_v4  ;;  %v2270_v13 = vld [vmem:[%s2933_s2 + $0x1a0] sm:$0xff]   ;;  %v2274_v16 = vld [vmem:[%s2933_s2 + $0x198] sm:$0xff]  }
  0x2b   :  { %v209_v22 = vrot.slane %v195_v17, %v184_v15  ;;  %v193_v25 = vcombine.low %v185_v18, %v192_v20  ;;  %v406_v31 = vunpack.c.0.s8 %v405_v58  ;;  %v224_v32 = vsel %vm167_vm14, 1, %v2383_v4  ;;  %v2275_v17 = vld [vmem:[%s2933_s2 + $0x150] sm:$0xff]  }
  0x2c   :  { %v225_v35 = vsel %vm168_vm15, 1, %v2383_v4  ;;  %v226_v39 = vcombine.low %v218_v23, %v219_v24  ;;  %v227_v40 = vcombine.low %v220_v26, %v221_v27  ;;  %v243_v41 = vcombine.low %v222_v29, %v223_v30  ;;  %v2276_v18 = vld [vmem:[%s2933_s2 + $0x110] sm:$0xff]   ;;  %v2279_v23 = vld [vmem:[%s2933_s2 + $0x148] sm:$0xff]   ;;  %v2284_v29 = vld [vmem:[%s2933_s2 + $0x100] sm:$0xff]  }
  0x2d   :  { %v210_v28 = vcombine.low %v202_v21, %v209_v22  ;;  %vm211_vm0 = vcmp.ne.s32.totalorder %v193_v25, 0  ;;  %v2582_v38 = vsub.s32 %v406_v31, %v2487_v19  ;;  %v244_v42 = vcombine.low %v224_v32, %v225_v35  ;;  %v2277_v21 = vld [vmem:[%s2933_s2 + $0x1d0] sm:$0xff]   ;;  %v2280_v24 = vld [vmem:[%s2933_s2 + $0x108] sm:$0xff]   ;;  %v2285_v31 = vld [vmem:[%s2933_s2 + $0x1c0] sm:$0xff]  }
  0x2e   :  { %v213_v33 = vsel %vm211_vm0, 1, %v2383_v4  ;;  %v234_v46 = vrot.slane %v226_v39, %v184_v15  ;;  %v241_v47 = vrot.slane %v227_v40, %v184_v15  ;;  %v251_v48 = vrot.slane %v243_v41, %v184_v15  ;;  %v2278_v22 = vld [vmem:[%s2933_s2 + $0x190] sm:$0xff]   ;;  %v2281_v26 = vld [vmem:[%s2933_s2 + $0x1c8] sm:$0xff]   ;;  %v2286_v32 = vld [vmem:[%s2933_s2 + $0x180] sm:$0xff]  }
  0x2f   :  { %vm212_vm1 = vcmp.ne.s32.totalorder %v210_v28, 0  ;;  %v258_v49 = vrot.slane %v244_v42, %v184_v15  ;;  %v2273_v15 = vld [vmem:[%s2933_s2 + $0x1d8] sm:$0xff]   ;;  %v2282_v27 = vld [vmem:[%s2933_s2 + $0x188] sm:$0xff]   ;;  %v2283_v28 = vld [vmem:[%s2933_s2 + $0x140] sm:$0xff]  }
  0x30   :  { %v214_v34 = vsel %vm212_vm1, 1, %v2383_v4  ;;  %v242_v58 = vcombine.low %v234_v46, %v241_v47  ;;  %v2288_v35 = vld [vmem:[%s2935_s4 + $0x38] sm:$0xff]   ;;  %v2291_v41 = vld [vmem:[%s2935_s4 + $0x70] sm:$0xff]   ;;  %v2295_v46 = vld [vmem:[%s2935_s4 + $0x68] sm:$0xff]  }
  0x31   :  { %v215_v37 = vpack.c.b16 %v214_v34, %v213_v33  ;;  %v259_v59 = vcombine.low %v251_v48, %v258_v49  ;;  %v2287_v34 = vld [vmem:[%s2935_s4 + $0x78] sm:$0xff]   ;;  %v2292_v42 = vld [vmem:[%s2935_s4 + $0x30] sm:$0xff]   ;;  %v2296_v47 = vld [vmem:[%s2935_s4 + $0x28] sm:$0xff]  }
  0x32   :  { %vm260_vm3 = vcmp.ne.s32.totalorder %v242_v58, 0  ;;  %v2290_v39 = vld [vmem:[%s2935_s4 + $0xb8] sm:$0xff]   ;;  %v2297_v48 = vld [vmem:[%s2935_s4 + $0xe8] sm:$0xff]  }
  0x33   :  { %vm216_vm2 = vcmp.ne.s16.totalorder %v215_v37, 0  ;;  %vm261_vm4 = vcmp.ne.s32.totalorder %v259_v59, 0  ;;  %v262_v8 = vsel %vm260_vm3, 1, %v2383_v4  ;;  %v2289_v37 = vld [vmem:[%s2935_s4 + $0xf8] sm:$0xff]   ;;  %v2298_v49 = vld [vmem:[%s2935_s4 + $0xa8] sm:$0xff]   ;;  %v2308_v59 = vld [vmem:[%s2935_s4 + $0x10] sm:$0xff]  }
  0x34   :  { %v217_v43 = vsel %vm216_vm2, %v2579_v36, 0  ;;  %v263_v9 = vsel %vm261_vm4, 1, %v2383_v4  ;;  %v2271_v4 = vld [vmem:[%s2933_s2 + $0x158] sm:$0xff]  }
  0x35   :  { %v403_v44 = vcombine.high %v217_v43, %v217_v43  ;;  %v410_v45 = vrot.slane %v217_v43, %v2582_v38  ;;  %v264_v12 = vpack.c.b16 %v263_v9, %v262_v8  ;;  %v2318_v8 = vld [vmem:[%s2935_s4 + $0x80] sm:$0xff]  }
  0x37   :  { %v418_v50 = vcombine.high %v410_v45, %v410_v45  ;;  %v426_v51 = vrot.slane %v410_v45, %v2582_v38  ;;  %v2588_v19 = vrot.slane %v403_v44, %v2582_v38  ;;  %vm265_vm5 = vcmp.ne.s16.totalorder %v264_v12, 0  ;;  %v2293_v44 = vld [vmem:[%s2935_s4 + $0xf0] sm:$0xff]  }
  0x38   :  { %v2657_v20 = vsel %vm265_vm5, %v2579_v36, 0  ;;  %v2294_v45 = vld [vmem:[%s2935_s4 + $0xb0] sm:$0xff]  }
  0x39   :  { %v440_v53 = vrot.slane %v418_v50, %v2582_v38  ;;  %v419_v55 = vcombine.high %v2588_v19, %v2588_v19  ;;  %v448_v56 = vcombine.high %v426_v51, %v426_v51  ;;  %v2673_v25 = vrot.slane %v2657_v20, %v2582_v38  ;;  %v2299_v50 = vld [vmem:[%s2935_s4 + $0x60] sm:$0xff]  }
  0x3a   :  { %v433_v33 = vrot.slane %v2588_v19, %v2582_v38  ;;  %v2301_v19 = vld [vmem:[%s2935_s4 + $0xe0] sm:$0xff]   ;;  %v1140_v58 = vcombine.high %v2657_v20, %v2657_v20  ;;  %v2327_v20 = vld [vmem:[%s2935_s4 + $0x168] sm:$0xff]  }
  0x3b   :  { %876 = vmatprep.mubr.bf16.mxu0 %v440_v53  ;;  %v450_v60 = vcombine.high %v440_v53, %v440_v53  ;;  %v447_v62 = vrot.slane %v419_v55, %v2582_v38  ;;  %v1155_v30 = vcombine.high %v2673_v25, %v2673_v25  ;;  %v2303_v53 = vld [vmem:[%s2935_s4 + $0x58] sm:$0xff]   ;;  %v1163_v9 = vrot.slane %v2673_v25, %v2582_v38 }
  0x3c   :  { %877 = vmatmul.mubr.bf16.vlgmr.msra.gmra.mxu0 %v426_v51  ;;  %v449_v40 = vcombine.high %v433_v33, %v433_v33  ;;  %v2300_v51 = vld [vmem:[%s2935_s4 + $0x20] sm:$0xff]   ;;  %v2305_v55 = vld [vmem:[%s2935_s4 + $0xd8] sm:$0xff]  }
  0x3d   :  { %2068 = vmatpush3.bf16.msra.mxu0 %v2256_v52  ;;  %916 = vmatprep.mubr.bf16.mxu1 %v450_v60  ;;  %v451_v1 = vcombine.high %v447_v62, %v447_v62  ;;  %v1177_v36 = vrot.slane %v1155_v30, %v2582_v38  ;;  %v2302_v52 = vld [vmem:[%s2935_s4 + $0xa0] sm:$0xff]   ;;  %v2309_v60 = vld [vmem:[%s2935_s4 + $0xd0] sm:$0xff]  }
  0x3e   :  { %917 = vmatmul.mubr.bf16.vlgmr.msra.gmra.mxu1 %v448_v56  ;;  %2069 = vmatprep.subr.bf16.mxu0 %v2259_v57  ;;  %v2306_v56 = vld [vmem:[%s2935_s4 + $0x98] sm:$0xff]   ;;  %v2307_v57 = vld [vmem:[%s2935_s4 + $0x50] sm:$0xff]  }
  0x3f   :  { %2090 = vmatpush3.bf16.msra.mxu1 %v2258_v54  ;;  %956 = vmatprep.mubr.bf16.mxu0 %v447_v62  ;;  %v1187_v43 = vcombine.high %v1177_v36, %v1177_v36  ;;  %v2304_v54 = vld [vmem:[%s2935_s4 + $0x18] sm:$0xff]   ;;  %v2311_v62 = vld [vmem:[%s2935_s4 + $0x48] sm:$0xff]  }
  0x40   :  { %2091 = vmatprep.subr.bf16.mxu1 %v2261_v63  ;;  %996 = vmatprep.mubr.bf16.mxu1 %v451_v1  ;;  %v2312_v63 = vld [vmem:[%s2935_s4 + $0x8] sm:$0xff]  }
  0x41   :  { %2070 = vmatpush3.bf16.msra.mxu0 %v2260_v61  ;;  %v2310_v61 = vld [vmem:[%s2935_s4 + $0x90] sm:$0xff]   ;;  %v2313_v1 = vld [vmem:[%s2935_s4 + $0xc8] sm:$0xff]  }
  0x42   :  { %2071 = vmatprep.subr.bf16.mxu0 %v2263_v2  ;;  %v2314_v2 = vld [vmem:[%s2935_s4 + $0x88] sm:$0xff]  }
  0x43   :  { %2092 = vmatpush3.bf16.msra.mxu1 %v2262_v0  ;;  %v2779_v0 = vrot.slane %v1140_v58, %v2582_v38 }
  0x44   :  { %2093 = vmatprep.subr.bf16.mxu1 %v2265_v5  ;;  %v2316_v5 = vld [vmem:[%s2935_s4] sm:$0xff]  }
  0x45   :  { %2072 = vmatpush3.bf16.msra.mxu0 %v2264_v3  ;;  %v2315_v3 = vld [vmem:[%s2935_s4 + $0x40] sm:$0xff]  }
  0x46   :  { %2073 = vmatprep.subr.bf16.mxu0 %v2267_v7  ;;  %v2317_v7 = vld [vmem:[%s2935_s4 + $0xc0] sm:$0xff]  }
  0x47   :  { %2094 = vmatpush3.bf16.msra.mxu1 %v2266_v6  ;;  %v1156_v6 = vcombine.high %v2779_v0, %v2779_v0 }
  0x48   :  { %2095 = vmatprep.subr.bf16.mxu1 %v2269_v11  ;;  %v2320_v11 = vld [vmem:[%s2935_s4 + $0x138] sm:$0xff]  }
  0x49   :  { %2074 = vmatpush3.bf16.msra.mxu0 %v2268_v10  ;;  %v2319_v10 = vld [vmem:[%s2935_s4 + $0x178] sm:$0xff]   ;;  %v1184_v12 = vrot.slane %v1156_v6, %v2582_v38 }
  0x4a   :  { %2075 = vmatprep.subr.bf16.mxu0 %v2271_v4  ;;  %v2322_v4 = vld [vmem:[%s2935_s4 + $0x1b8] sm:$0xff]  }
  0x4b   :  { %2096 = vmatpush3.bf16.msra.mxu1 %v2270_v13  ;;  %v2321_v13 = vld [vmem:[%s2935_s4 + $0x1f8] sm:$0xff]  }
  0x4c   :  { %2097 = vmatprep.subr.bf16.mxu1 %v2273_v15  ;;  %v2323_v15 = vld [vmem:[%s2935_s4 + $0x170] sm:$0xff]  }
  0x4d   :  { %2076 = vmatpush3.bf16.msra.mxu0 %v2272_v14  ;;  %v1185_v14 = vcombine.high %v1163_v9, %v1163_v9 }
  0x4e   :  { %2077 = vmatprep.subr.bf16.mxu0 %v2275_v17  ;;  %v2325_v17 = vld [vmem:[%s2935_s4 + $0x1f0] sm:$0xff]  }
  0x4f   :  { %2098 = vmatpush3.bf16.msra.mxu1 %v2274_v16  ;;  %v2324_v16 = vld [vmem:[%s2935_s4 + $0x130] sm:$0xff]  }
  0x50   :  { %2099 = vmatprep.subr.bf16.mxu1 %v2277_v21 }
  0x51   :  { %2078 = vmatpush3.bf16.msra.mxu0 %v2276_v18  ;;  %v1188_v18 = vcombine.high %v1184_v12, %v1184_v12 }
  0x52   :  { %2079 = vmatprep.subr.bf16.mxu0 %v2279_v23 }
  0x53   :  { %2100 = vmatpush3.bf16.msra.mxu1 %v2278_v22 }
  0x54   :  { %2101 = vmatprep.subr.bf16.mxu1 %v2281_v26 }
  0x55   :  { %2080 = vmatpush3.bf16.msra.mxu0 %v2280_v24 }
  0x56   :  { %2081 = vmatprep.subr.bf16.mxu0 %v2283_v28 }
  0x57   :  { %2102 = vmatpush3.bf16.msra.mxu1 %v2282_v27 }
  0x58   :  { %2103 = vmatprep.subr.bf16.mxu1 %v2285_v31 }
  0x59   :  { %2082 = vmatpush3.bf16.msra.mxu0 %v2284_v29 }
  0x5a   :  { %2111 = vmatprep.subr.bf16.mxu0 %v2287_v34 }
  0x5b   :  { %2104 = vmatpush3.bf16.msra.mxu1 %v2286_v32 }
  0x5c   :  { %957 = vmatmul.mubr.bf16.vlgmr.msra.gmra.mxu0 %v433_v33  ;;  %2133 = vmatprep.subr.bf16.mxu1 %v2289_v37 }
  0x5d   :  { %2112 = vmatpush3.bf16.msra.mxu0 %v2288_v35  ;;  %1613 = vmatprep.mubr.bf16.mxu0 %v1177_v36 }
  0x5e   :  { %997 = vmatmul.mubr.bf16.vlgmr.msra.gmra.mxu1 %v449_v40  ;;  %2113 = vmatprep.subr.bf16.mxu0 %v2291_v41 }
  0x5f   :  { %2134 = vmatpush3.bf16.msra.mxu1 %v2290_v39  ;;  %1653 = vmatprep.mubr.bf16.mxu1 %v1187_v43 }
  0x60   :  { %2135 = vmatprep.subr.bf16.mxu1 %v2293_v44 }
  0x61   :  { %2114 = vmatpush3.bf16.msra.mxu0 %v2292_v42 }
  0x62   :  { %2115 = vmatprep.subr.bf16.mxu0 %v2295_v46 }
  0x63   :  { %2136 = vmatpush3.bf16.msra.mxu1 %v2294_v45 }
  0x64   :  { %2137 = vmatprep.subr.bf16.mxu1 %v2297_v48 }
  0x65   :  { %2116 = vmatpush3.bf16.msra.mxu0 %v2296_v47 }
  0x66   :  { %2117 = vmatprep.subr.bf16.mxu0 %v2299_v50 }
  0x67   :  { %2138 = vmatpush3.bf16.msra.mxu1 %v2298_v49 }
  0x68   :  { %2139 = vmatprep.subr.bf16.mxu1 %v2301_v19 }
  0x69   :  { %2118 = vmatpush3.bf16.msra.mxu0 %v2300_v51 }
  0x6a   :  { %2119 = vmatprep.subr.bf16.mxu0 %v2303_v53 }
  0x6b   :  { %2140 = vmatpush3.bf16.msra.mxu1 %v2302_v52 }
  0x6c   :  { %2141 = vmatprep.subr.bf16.mxu1 %v2305_v55 }
  0x6d   :  { %2120 = vmatpush3.bf16.msra.mxu0 %v2304_v54 }
  0x6e   :  { %2121 = vmatprep.subr.bf16.mxu0 %v2307_v57 }
  0x6f   :  { %2142 = vmatpush3.bf16.msra.mxu1 %v2306_v56 }
  0x70   :  { %2143 = vmatprep.subr.bf16.mxu1 %v2309_v60 }
  0x71   :  { %2122 = vmatpush3.bf16.msra.mxu0 %v2308_v59 }
  0x72   :  { %2123 = vmatprep.subr.bf16.mxu0 %v2311_v62 }
  0x73   :  { %2144 = vmatpush3.bf16.msra.mxu1 %v2310_v61 }
  0x74   :  { %2145 = vmatprep.subr.bf16.mxu1 %v2313_v1 }
  0x75   :  { %2124 = vmatpush3.bf16.msra.mxu0 %v2312_v63 }
  0x76   :  { %2125 = vmatprep.subr.bf16.mxu0 %v2315_v3 }
  0x77   :  { %2146 = vmatpush3.bf16.msra.mxu1 %v2314_v2 }
  0x78   :  { %2147 = vmatprep.subr.bf16.mxu1 %v2317_v7 }
  0x79   :  { %2126 = vmatpush3.bf16.msra.mxu0 %v2316_v5 }
  0x7a   :  { %2155 = vmatprep.subr.bf16.mxu0 %v2319_v10 }
  0x7b   :  { %2148 = vmatpush3.bf16.msra.mxu1 %v2318_v8 }
  0x7c   :  { %1614 = vmatmul.mubr.bf16.vlgmr.msra.gmra.mxu0 %v1163_v9  ;;  %2177 = vmatprep.subr.bf16.mxu1 %v2321_v13 }
  0x7d   :  { %2156 = vmatpush3.bf16.msra.mxu0 %v2320_v11  ;;  %1693 = vmatprep.mubr.bf16.mxu0 %v1184_v12 }
  0x7e   :  { %1654 = vmatmul.mubr.bf16.vlgmr.msra.gmra.mxu1 %v1185_v14  ;;  %2157 = vmatprep.subr.bf16.mxu0 %v2323_v15 }
  0x7f   :  { %14 = vsyncpa [#allocation5], 0  ;;  %2178 = vmatpush3.bf16.msra.mxu1 %v2322_v4  ;;  %v2326_v21 = vld [vmem:[%s2935_s4 + $0x1b0] sm:$0xff]   ;;  %1733 = vmatprep.mubr.bf16.mxu1 %v1188_v18  ;;  %v2329_v22 = vld [vmem:[%s2935_s4 + $0x1e8] sm:$0xff]   ;;  %v1170_v45 = vrot.slane %v2779_v0, %v2582_v38  ;;  %v2384_v49 = vmov 0.0   ;;  %vm2385_vm6 = vmmov 0  }
  0x80   :  { %2179 = vmatprep.subr.bf16.mxu1 %v2325_v17  ;;  %v2328_v23 = vld [vmem:[%s2935_s4 + $0x128] sm:$0xff]   ;;  %v2331_v24 = vld [vmem:[%s2935_s4 + $0x160] sm:$0xff]   ;;  %v2335_v28 = vld [vmem:[%s2935_s4 + $0x158] sm:$0xff]   ;;  %s2386_s10 = smov 32   ;;  %vm1760_vm8 = vcmask 261120   ;;  %vm1802_vm9 = vcmask 523264  }
  0x81   :  { %2158 = vmatpush3.bf16.msra.mxu0 %v2324_v16  ;;  %v2330_v25 = vld [vmem:[%s2935_s4 + $0x1a8] sm:$0xff]   ;;  %v2333_v26 = vld [vmem:[%s2935_s4 + $0x1e0] sm:$0xff]   ;;  %v2337_v30 = vld [vmem:[%s2935_s4 + $0x1d8] sm:$0xff]   ;;  %v1186_v47 = vcombine.high %v1170_v45, %v1170_v45  ;;  %s2387_s11 = smov [#allocation4]   ;;  %vm1846_vm10 = vcmask 9216  }
  0x82   :  { %2159 = vmatprep.subr.bf16.mxu0 %v2327_v20  ;;  %v2332_v27 = vld [vmem:[%s2935_s4 + $0x120] sm:$0xff]   ;;  %v2336_v31 = vld [vmem:[%s2935_s4 + $0x118] sm:$0xff]   ;;  %v2339_v32 = vld [vmem:[%s2935_s4 + $0x150] sm:$0xff]   ;;  %s1854_s12 = sshll.u32 %s2387_s11, 4  ;;  %s1855_s12 = int_to_ptr.vmem [resolvable:$true] %s1854_s12 }
  0x83   :  { %2180 = vmatpush3.bf16.msra.mxu1 %v2326_v21  ;;  %v2334_v29 = vld [vmem:[%s2935_s4 + $0x1a0] sm:$0xff]   ;;  %v2338_v33 = vld [vmem:[%s2935_s4 + $0x198] sm:$0xff]   ;;  %v2341_v34 = vld [vmem:[%s2935_s4 + $0x1d0] sm:$0xff]   ;;  %s2359_s13 = scalar_lea.vmem %s1855_s12, 32  ;;  %p2364_p1 = scmp.lt.s32.totalorder %s1855_s12, %s1855_s12 }
  0x84   :  { %2181 = vmatprep.subr.bf16.mxu1 %v2329_v22  ;;  %v2340_v35 = vld [vmem:[%s2935_s4 + $0x110] sm:$0xff]   ;;  %v2343_v36 = vld [vmem:[%s2935_s4 + $0x148] sm:$0xff]   ;;  %v2347_v41 = vld [vmem:[%s2935_s4 + $0x140] sm:$0xff]   ;;  %p2360_p0 = scmp.ne.s32.totalorder %s1855_s12, %s2359_s13  ;;  %p2365_p2 = scmp.lt.s32.totalorder %s2359_s13, %s2359_s13 }
  0x85   :  { %2160 = vmatpush3.bf16.msra.mxu0 %v2328_v23  ;;  %v2342_v37 = vld [vmem:[%s2935_s4 + $0x190] sm:$0xff]   ;;  %v2345_v39 = vld [vmem:[%s2935_s4 + $0x1c8] sm:$0xff]   ;;  %v2349_v43 = vld [vmem:[%s2935_s4 + $0x1c0] sm:$0xff]  }
  0x86   :  { %2161 = vmatprep.subr.bf16.mxu0 %v2331_v24  ;;  %v2344_v40 = vld [vmem:[%s2935_s4 + $0x108] sm:$0xff]   ;;  %v2348_v44 = vld [vmem:[%s2935_s4 + $0x100] sm:$0xff]   ;;  %v2351_v48 = vld [vmem:[%s2937_s6 + $0x18] sm:$0xff]   ;;  %p2366_p3 = por %p2365_p2, %p2364_p1 }
  0x87   :  { %2182 = vmatpush3.bf16.msra.mxu1 %v2330_v25  ;;  %v2346_v42 = vld [vmem:[%s2935_s4 + $0x188] sm:$0xff]   ;;  %v2350_v46 = vld [vmem:[%s2935_s4 + $0x180] sm:$0xff]   ;;  %v2352_v38 = vld [vmem:[%s2937_s6 + $0x10] sm:$0xff]  }
  0x88   :  { %2183 = vmatprep.subr.bf16.mxu1 %v2333_v26  ;;  %v1886_v51 = vld [vmem:[%s2934_s3] ss:$0 sm:$0xff]  ;;  %v2353_v56 = vld [vmem:[%s2937_s6 + $0x8] sm:$0xff]   ;;  %p2367_p4 = pnand %p2366_p3, %p2360_p0 }
  0x89   :  { %2162 = vmatpush3.bf16.msra.mxu0 %v2332_v27  ;;  %v1951_v21 = vld [vmem:[%s2936_s5] ss:$0 sm:$0xff] }
  0x8a   :  { %2163 = vmatprep.subr.bf16.mxu0 %v2335_v28 }
  0x8b   :  { %2184 = vmatpush3.bf16.msra.mxu1 %v2334_v29 }
  0x8c   :  { %2185 = vmatprep.subr.bf16.mxu1 %v2337_v30 }
  0x8d   :  { %2164 = vmatpush3.bf16.msra.mxu0 %v2336_v31 }
  0x8e   :  { %2165 = vmatprep.subr.bf16.mxu0 %v2339_v32 }
  0x8f   :  { %2186 = vmatpush3.bf16.msra.mxu1 %v2338_v33 }
  0x90   :  { %2187 = vmatprep.subr.bf16.mxu1 %v2341_v34 }
  0x91   :  { %2166 = vmatpush3.bf16.msra.mxu0 %v2340_v35 }
  0x92   :  { %2167 = vmatprep.subr.bf16.mxu0 %v2343_v36 }
  0x93   :  { %2188 = vmatpush3.bf16.msra.mxu1 %v2342_v37 }
  0x94   :  { %2189 = vmatprep.subr.bf16.mxu1 %v2345_v39 }
  0x95   :  { %2168 = vmatpush3.bf16.msra.mxu0 %v2344_v40  ;;  %v2354_v40 = vld [vmem:[%s2937_s6] sm:$0xff]  }
  0x96   :  { %2169 = vmatprep.subr.bf16.mxu0 %v2347_v41 }
  0x97   :  { %2190 = vmatpush3.bf16.msra.mxu1 %v2346_v42 }
  0x98   :  { %2191 = vmatprep.subr.bf16.mxu1 %v2349_v43 }
  0x99   :  { %2170 = vmatpush3.bf16.msra.mxu0 %v2348_v44 }
  0x9a   :  { %2204 = vmatprep.subr.bf16.mxu0 %v2384_v49 }
  0x9b   :  { %2192 = vmatpush3.bf16.msra.mxu1 %v2350_v46 }
  0x9c   :  { %1694 = vmatmul.mubr.bf16.vlgmr.msra.gmra.mxu0 %v1170_v45 }
  0x9d   :  { %2205 = vmatpush3.bf16.msra.mxu0 %v2351_v48  ;;  %2212 = vmatprep.mubr.msk.bf16.mxu0 %vm2385_vm6, %v2384_v49 }
  0x9e   :  { %1734 = vmatmul.mubr.bf16.vlgmr.msra.gmra.mxu1 %v1186_v47  ;;  %2206 = vmatprep.subr.bf16.mxu0 %v2384_v49 }
  0xa1   :  { %2207 = vmatpush3.bf16.msra.mxu0 %v2352_v38 }
  0xa2   :  { %2208 = vmatprep.subr.bf16.mxu0 %v2384_v49 }
  0xa5   :  { %2209 = vmatpush3.bf16.msra.mxu0 %v2353_v56 }
  0xa6   :  { %2210 = vmatprep.subr.bf16.mxu0 %v2384_v49 }
  0xa9   :  { %2211 = vmatpush3.bf16.msra.mxu0 %v2354_v40 }
  0xfc   :  { %v2039_v50 = vpop.f32.mrf.mxu0 }
  0xfe   :  { %v2040_v19 = vpop.f32.mrf.mxu0  ;;  %v2061_v52 = vpop.f32.mrf.mxu1 }
  0xff   :  { %v2041_v53 = vadd.f32 %v2040_v19, %v2039_v50 }
 0x100   :  { %v2042_v54 = vpop.f32.mrf.mxu0  ;;  %v2062_v55 = vpop.f32.mrf.mxu1 }
 0x101   :  { %v879_v57 = vadd.f32 %v2041_v53, %v1886_v51  ;;  %v2063_v58 = vadd.f32 %v2062_v55, %v2061_v52  ;;  %v2017_v54 = vld [vmem:[%s2938_s7] ss:$0 sm:$0xff] }
 0x102   :  { %v2043_v59 = vpop.f32.mrf.mxu0  ;;  %v2064_v60 = vpop.f32.mrf.mxu1 }
 0x103   :  { %v919_v61 = vadd.f32 %v2063_v58, %v879_v57 }
 0x104   :  { %v2065_v62 = vpop.f32.mrf.mxu1 }
 0x11c   :  { %v2083_v63 = vpop.f32.mrf.mxu0 }
 0x11e   :  { %v2084_v0 = vpop.f32.mrf.mxu0  ;;  %v2105_v1 = vpop.f32.mrf.mxu1 }
 0x11f   :  { %v2085_v2 = vadd.f32 %v2084_v0, %v2083_v63 }
 0x120   :  { %v2086_v3 = vpop.f32.mrf.mxu0  ;;  %v2106_v5 = vpop.f32.mrf.mxu1 }
 0x121   :  { %v959_v6 = vadd.f32 %v2085_v2, %v919_v61  ;;  %v2107_v7 = vadd.f32 %v2106_v5, %v2105_v1 }
 0x122   :  { %v2087_v8 = vpop.f32.mrf.mxu0  ;;  %v2108_v9 = vpop.f32.mrf.mxu1 }
 0x123   :  { %v999_v10 = vadd.f32 %v2107_v7, %v959_v6 }
 0x124   :  { %v2109_v11 = vpop.f32.mrf.mxu1 }
 0x125   :  { %v1742_v44 = vmul.f32 %v999_v10, %v999_v10  ;;  %v1741_v51 = vmul.f32 0.5, %v999_v10 }
 0x127   :  { %v1743_v45 = vmul.f32 %v1742_v44, %v999_v10 }
 0x129   :  { %v1744_v46 = vmul.f32 0.044715, %v1743_v45 }
 0x12b   :  { %v1745_v47 = vadd.f32 %v1744_v46, %v999_v10 }
 0x12d   :  { %v1746_v48 = vmul.f32 0.7978846, %v1745_v47 }
 0x13c   :  { %v2127_v12 = vpop.f32.mrf.mxu0 }
 0x13e   :  { %v2128_v13 = vpop.f32.mrf.mxu0  ;;  %v2149_v4 = vpop.f32.mrf.mxu1 }
 0x13f   :  { %v2129_v20 = vadd.f32 %v2128_v13, %v2127_v12 }
 0x140   :  { %v2130_v14 = vpop.f32.mrf.mxu0  ;;  %v2150_v15 = vpop.f32.mrf.mxu1 }
 0x141   :  { %v1616_v22 = vadd.f32 %v2129_v20, %v1951_v21  ;;  %v2151_v23 = vadd.f32 %v2150_v15, %v2149_v4 }
 0x142   :  { %v2131_v16 = vpop.f32.mrf.mxu0  ;;  %v2152_v17 = vpop.f32.mrf.mxu1 }
 0x143   :  { %v1656_v27 = vadd.f32 %v2151_v23, %v1616_v22 }
 0x144   :  { %v2153_v18 = vpop.f32.mrf.mxu1 }
 0x15c   :  { %v2171_v24 = vpop.f32.mrf.mxu0 }
 0x15e   :  { %v2172_v25 = vpop.f32.mrf.mxu0  ;;  %v2193_v26 = vpop.f32.mrf.mxu1 }
 0x15f   :  { %v2173_v28 = vadd.f32 %v2172_v25, %v2171_v24 }
 0x160   :  { %v2174_v29 = vpop.f32.mrf.mxu0  ;;  %v2194_v30 = vpop.f32.mrf.mxu1 }
 0x161   :  { %v1696_v31 = vadd.f32 %v2173_v28, %v1656_v27  ;;  %v2195_v32 = vadd.f32 %v2194_v30, %v2193_v26 }
 0x162   :  { %v2175_v33 = vpop.f32.mrf.mxu0  ;;  %v2196_v34 = vpop.f32.mrf.mxu1 }
 0x163   :  { %v1736_v35 = vadd.f32 %v2195_v32, %v1696_v31 }
 0x164   :  { %v2197_v36 = vpop.f32.mrf.mxu1 }
 0x165   :  { %v1751_v37 = vmin.f32 %v1736_v35, 0.0  ;;  %vm1750_vm7 = vcmp.gt.f32.partialorder %v1736_v35, 0.0 }
 0x167   :  { %v1752_v39 = vmul.f32 1.442695, %v1751_v37 }
 0x169   :  { %2355 = vpow2.f32 %v1752_v39 }
 0x16a   :  { %2357 = vtanh.f32 %v1746_v48 }
 0x176   :  { %v2356_v41 = vpop.eup %2355 }
 0x177   :  { %v2016_v42 = vadd.f32 -1.0, %v2356_v41  ;;  %v2358_v50 = vpop.eup %2357 }
 0x178   :  { %v1748_v38 = vadd.f32 1.0, %v2358_v50 }
 0x179   :  { %v1755_v43 = vsel %vm1750_vm7, %v1736_v35, %v2016_v42 }
 0x17a   :  { %1757 = vrot.lane.b32.xlu0 %v1755_v43, %s2386_s10  ;;  %v1749_v19 = vmul.f32 %v1748_v38, %v1741_v51 }
 0x1ec   :  { %v1758_v52 = vpop.permute.xlu0 %1757 }
 0x1ed   :  { %v1761_v53 = vsel %vm1760_vm8, %v1749_v19, %v1758_v52 }
 0x1ee   :  { %v1762_v49 = vpack.c.bf16 %v1761_v53, %v1761_v53 }
 0x1f0   :  { %2213 = vmatmul.mubr.msk.bf16.vlgmr.msra.gmra.mxu0 %vm1802_vm9, %v1762_v49 }
 0x2b0   :  { %v1840_v55 = vpop.f32.mrf.mxu0 }
 0x2b1   :  { %v1841_v56 = vadd.f32 %v2017_v54, %v1840_v55 }
 0x2b2   :  { %v2214_v57 = vpop.f32.mrf.mxu0 }
 0x2b3   :  { %1847 = vst.msk [vmem:[#allocation4] sm:$0x3] %vm1846_vm10, %v1841_v56 }
 0x2b4   :  { %v1843_v58 = vpop.f32.mrf.mxu0 }
 0x2b5   :  { %2370 = shalt.err (!%p2367_p4)
}
 0x2b6   :  { %1857 = dma.vmem_to_hbm [thread:$0]  %s1855_s12, 32, %s2939_s8, [#allocation5]   ;;  %v2215_v59 = vpop.f32.mrf.mxu0 }
 0x2b7   :  { %2379 = dma.done.wait [#allocation5], 32  }
 0x2b8   :  { %2380 = vsyncadd [#allocation5], 4294967264 }
 0x2b9   :  { %1861 = vsyncpa [#allocation5], 1 }

</bundles_post_ra>
